<compile_context>
chip_gen: v7x
topology: tpu7x:2x2x1
jax: 0.10.0
libtpu: 0.0.40
codegen_flags: <defaults>
</compile_context>

<pallas_src>
import functools

import jax
import jax.numpy as jnp
import numpy as np
from jax.experimental import pallas as pl
from jax.experimental.pallas import tpu as pltpu


def _round_up(v, m):
    return (v + m - 1) // m * m


# -----------------------------------------------------------------------------
# Pallas kernel: single fused matmul -> lane-dense output slab.
# -----------------------------------------------------------------------------
def _retriever_kernel(x_ref, w_ref, out_ref, *, d):
    # (TN, Kp) @ (Kp, Dout) -> (TN, Dout) on the MXU.
    fused = jnp.dot(x_ref[...], w_ref[...], preferred_element_type=jnp.float32)
    # Column layout of `fused`: [0:d) = transformed, d = logits (t . src),
    # rest = zeros.  Stash per-row sum(t*t) into column d+1 so the cosine
    # numerator/denominator come out of the same lane-dense slab (no extra
    # (TN, 1) masked stores, no re-read of `transformed` from HBM).
    col = jax.lax.broadcasted_iota(jnp.int32, fused.shape, 1)
    t_only = jnp.where(col < d, fused, 0.0)
    tsq = jnp.sum(t_only * t_only, axis=-1, keepdims=True)
    out_ref[...] = jnp.where(col == d + 1, tsq, fused)


def retriever_pallas(x_pad, w_big, *, d, tile_n):
    """x_pad: (N_pad, K_pad) f32, w_big: (K_pad, D_out) f32."""
    n_pad, k_pad = x_pad.shape
    d_out = w_big.shape[1]
    grid = (n_pad // tile_n,)
    return pl.pallas_call(
        functools.partial(_retriever_kernel, d=d),
        out_shape=jax.ShapeDtypeStruct((n_pad, d_out), jnp.float32),
        grid_spec=pltpu.PrefetchScalarGridSpec(
            num_scalar_prefetch=0,
            grid=grid,
            in_specs=[
                pl.BlockSpec((tile_n, k_pad), lambda i: (i, 0)),
                pl.BlockSpec((k_pad, d_out), lambda i: (0, 0)),
            ],
            out_specs=pl.BlockSpec((tile_n, d_out), lambda i: (i, 0)),
        ),
        compiler_params=pltpu.CompilerParams(
            dimension_semantics=("parallel",)),
    )(x_pad, w_big)


# -----------------------------------------------------------------------------
# Device-side forward: everything with fixed shapes lives inside one jit.
# -----------------------------------------------------------------------------
@functools.partial(jax.jit, static_argnames=("top_k", "max_tile_n"))
def _device_forward(node_embeddings, source_node_idx, distance_tensor,
                    label_node_idx, dist_enc_table, linear_weight,
                    *, top_k, max_tile_n=1024):
    N, D = node_embeddings.shape
    Dp2 = D + 2
    k_pad = _round_up(Dp2, 128)          # contraction dim padded to 128
    d_out = _round_up(D + 2, 128)        # room for logits col D, ||t||^2 col D+1
    tile_n = min(max_tile_n, _round_up(N, 8))
    n_pad = _round_up(N, tile_n)

    # Tiny glue: (3, 2) distance-encoding lookup + concat + zero padding.
    dist_idx = jnp.clip(distance_tensor - 1, 0, 2)
    dist_enc = jnp.take(dist_enc_table, dist_idx, axis=0).astype(
        node_embeddings.dtype)
    x = jnp.concatenate([node_embeddings, dist_enc], axis=1)
    x_pad = jnp.pad(x, ((0, n_pad - N), (0, k_pad - Dp2))).astype(jnp.float32)

    src = node_embeddings[source_node_idx].astype(jnp.float32)      # (D,)
    wT = linear_weight.T.astype(jnp.float32)                        # (D+2, D)
    v = wT @ src                                                    # (D+2,)
    w_big = jnp.zeros((k_pad, d_out), jnp.float32)
    w_big = w_big.at[:Dp2, :D].set(wT)
    w_big = w_big.at[:Dp2, D].set(v)
    # TODO(synk): cast x_pad / w_big to bfloat16 here for v6e/v7x MXU peak if
    # the accuracy budget allows (kept f32 to match the reference exactly).

    fused = retriever_pallas(x_pad, w_big, d=D, tile_n=tile_n)[:N]
    transformed = fused[:, :D]
    logits = fused[:, D]
    t_norm = jnp.sqrt(fused[:, D + 1])
    s_norm = jnp.sqrt(jnp.sum(src * src))
    cos_sim = logits / jnp.maximum(t_norm * s_norm, 1e-8)

    # Retrieval loss: numerically-stable form of
    #   -sum(log(exp(label_logits) / sum(exp(logits))))
    label_logits = logits[label_node_idx]
    lse = jax.nn.logsumexp(logits)
    loss = jnp.sum(lse - label_logits)

    # Distance-weighted top-k scoring (fixed shapes on device).
    distances = distance_tensor
    valid_mask = distances <= 2
    one_hop_mask = distances == 1
    weights = jnp.where(distances == 1, 1.5,
                        jnp.where(distances == 2, 2.0, 1.0)).astype(jnp.float32)
    weighted = jnp.where(valid_mask, cos_sim * weights, -jnp.inf)
    _, topk_idx = jax.lax.top_k(weighted, min(top_k, N))
    num_valid = jnp.sum(valid_mask.astype(jnp.int32))

    return (loss, transformed, cos_sim, logits,
            num_valid, topk_idx, valid_mask, one_hop_mask)


# -----------------------------------------------------------------------------
# Full forward: jitted device path + one batched D2H for the variable-length
# selection bookkeeping.
# -----------------------------------------------------------------------------
def node_retriever_forward(node_embeddings, source_node_idx, distance_tensor,
                           label_node_idx, dist_enc_table, linear_weight,
                           top_k, max_tile_n=1024):
    (loss, transformed, cos_sim, logits, num_valid, topk_idx, valid_mask,
     one_hop_mask) = _device_forward(
        node_embeddings, jnp.asarray(source_node_idx, jnp.int32),
        distance_tensor, jnp.asarray(label_node_idx, jnp.int32),
        dist_enc_table, linear_weight, top_k=top_k, max_tile_n=max_tile_n)

    # TODO(synk): the variable-length nonzero / unique / "< top_k" branch has
    # no fixed-shape Pallas/jit form; finalize host-side after ONE device_get.
    num_valid_h, topk_idx_h, valid_mask_h, one_hop_mask_h = jax.device_get(
        (num_valid, topk_idx, valid_mask, one_hop_mask))

    if int(num_valid_h) < top_k:
        cand = np.nonzero(valid_mask_h)[0]            # all valid indices
    else:
        cand = np.asarray(topk_idx_h)                 # top-k by weighted sim
    final_top_k = np.unique(np.concatenate([
        cand.astype(np.int64),
        np.nonzero(one_hop_mask_h)[0].astype(np.int64),
        np.array([int(source_node_idx)], dtype=np.int64),
    ]))

    return loss, jnp.asarray(final_top_k), transformed, cos_sim, logits


# -----------------------------------------------------------------------------
if __name__ == "__main__":
    N, D, TOP_K = 64, 32, 5

    key = jax.random.PRNGKey(0)
    k_emb, k_table, k_w, k_dist = jax.random.split(key, 4)

    node_embeddings = jax.random.normal(k_emb, (N, D), dtype=jnp.float32)
    dist_enc_table = jax.random.normal(k_table, (3, 2), dtype=jnp.float32)
    # nn.Linear(D+2, D, bias=False).weight has shape (D, D+2)
    linear_weight = (jax.random.normal(k_w, (D, D + 2), dtype=jnp.float32)
                     / jnp.sqrt(D + 2.0))
    distance_tensor = jax.random.randint(k_dist, (N,), 0, 5, dtype=jnp.int32)

    source_node_idx = 3
    label_node_idx = jnp.array([7, 11, 20], dtype=jnp.int32)

    loss, final_top_k, transformed, cos_sim, logits = node_retriever_forward(
        node_embeddings, source_node_idx, distance_tensor, label_node_idx,
        dist_enc_table, linear_weight, TOP_K)

    jax.block_until_ready((loss, transformed, cos_sim, logits))
    jax.block_until_ready(final_top_k)

    # ---- pure-JAX reference checks ----
    dist_idx = jnp.clip(distance_tensor - 1, 0, 2)
    x_ref = jnp.concatenate(
        [node_embeddings, jnp.take(dist_enc_table, dist_idx, axis=0)], axis=1)
    t_ref = x_ref @ linear_weight.T
    src_ref = node_embeddings[source_node_idx]
    logits_ref = t_ref @ src_ref
    cos_ref = logits_ref / jnp.maximum(
        jnp.linalg.norm(t_ref, axis=1) * jnp.linalg.norm(src_ref), 1e-8)
    label_logits_ref = logits_ref[label_node_idx]
    loss_ref = -jnp.sum(jnp.log(jnp.exp(label_logits_ref)
                                / jnp.sum(jnp.exp(logits_ref))))

    np.testing.assert_allclose(np.asarray(transformed), np.asarray(t_ref),
                               rtol=1e-5, atol=1e-5)
    np.testing.assert_allclose(np.asarray(logits), np.asarray(logits_ref),
                               rtol=1e-3, atol=1e-3)
    np.testing.assert_allclose(np.asarray(cos_sim), np.asarray(cos_ref),
                               rtol=1e-3, atol=1e-3)
    np.testing.assert_allclose(float(loss), float(loss_ref),
                               rtol=1e-3, atol=1e-2)

    print("KERNEL_OK")
</pallas_src>

<mosaic_0001>
module attributes {stable_mosaic.version = 11 : i64} {
  func.func @_retriever_kernel(%arg0: i32, %arg1: memref<64x128xf32, #tpu.memory_space<vmem>>, %arg2: memref<128x128xf32, #tpu.memory_space<vmem>>, %arg3: memref<64x128xf32, #tpu.memory_space<vmem>>) attributes {dimension_semantics = [#tpu.dimension_semantics<parallel>], iteration_bounds = array<i64: 1>, scalar_prefetch = 0 : i64, scratch_operands = 0 : i64, tpu.core_type = #tpu.core_type<tc>, window_params = [{transform_indices = @transform_0, window_bounds = array<i64: 64, 128>}, {pipeline_mode = #tpu.pipeline_mode<synchronous>, transform_indices = @transform_1, window_bounds = array<i64: 128, 128>}, {transform_indices = @transform_2, window_bounds = array<i64: 64, 128>}]} {
    %c0 = arith.constant 0 : index
    %c0_0 = arith.constant 0 : index
    %0 = vector.load %arg1[%c0, %c0_0] : memref<64x128xf32, #tpu.memory_space<vmem>>, vector<64x128xf32>
    %c0_1 = arith.constant 0 : index
    %c0_2 = arith.constant 0 : index
    %1 = vector.load %arg2[%c0_1, %c0_2] : memref<128x128xf32, #tpu.memory_space<vmem>>, vector<128x128xf32>
    %cst = arith.constant dense<0.000000e+00> : vector<64x128xf32>
    %2 = tpu.matmul %0, %1, %cst {dimension_numbers = #tpu.dot_dimension_numbers<[1], [0], [0], [1], [0, 0, 1, 1], [], []>} : vector<64x128xf32>, vector<128x128xf32>, vector<64x128xf32> -> vector<64x128xf32>
    %3 = tpu.iota {dimensions = array<i32: 1>} : vector<64x128xi32>
    %c32_i32 = arith.constant 32 : i32
    %4 = vector.broadcast %c32_i32 : i32 to vector<64x128xi32>
    %5 = arith.cmpi slt, %3, %4 : vector<64x128xi32>
    %cst_3 = arith.constant 0.000000e+00 : f32
    %6 = vector.broadcast %cst_3 : f32 to vector<64x128xf32>
    %7 = arith.select %5, %2, %6 : vector<64x128xi1>, vector<64x128xf32>
    %8 = arith.mulf %7, %7 : vector<64x128xf32>
    %cst_4 = arith.constant dense<0.000000e+00> : vector<64xf32>
    %9 = vector.multi_reduction <add>, %8, %cst_4 [1] : vector<64x128xf32> to vector<64xf32>
    %10 = vector.shape_cast %9 : vector<64xf32> to vector<64x1xf32>
    %c33_i32 = arith.constant 33 : i32
    %11 = vector.broadcast %c33_i32 : i32 to vector<64x128xi32>
    %12 = arith.cmpi eq, %3, %11 : vector<64x128xi32>
    %13 = vector.shape_cast %10 : vector<64x1xf32> to vector<64x1xf32>
    %14 = vector.broadcast %13 : vector<64x1xf32> to vector<64x128xf32>
    %15 = arith.select %12, %14, %2 : vector<64x128xi1>, vector<64x128xf32>
    %c0_5 = arith.constant 0 : index
    %c0_6 = arith.constant 0 : index
    %16 = vector.load %arg3[%c0_5, %c0_6] : memref<64x128xf32, #tpu.memory_space<vmem>>, vector<64x128xf32>
    tpu.vector_store %arg3[%c0_5, %c0_6], %15 {strides = array<i32>} : memref<64x128xf32, #tpu.memory_space<vmem>>, vector<64x128xf32>,
    return
  }
  func.func @transform_0(%arg0: i32) -> (i32, i32) {
    %c0_i32 = arith.constant 0 : i32
    %c0_i32_0 = arith.constant 0 : i32
    return %arg0, %c0_i32 : i32, i32
  }
  func.func @transform_1(%arg0: i32) -> (i32, i32) {
    %c0_i32 = arith.constant 0 : i32
    %c0_i32_0 = arith.constant 0 : i32
    %c0_i32_1 = arith.constant 0 : i32
    return %c0_i32, %c0_i32_0 : i32, i32
  }
  func.func @transform_2(%arg0: i32) -> (i32, i32) {
    %c0_i32 = arith.constant 0 : i32
    %c0_i32_0 = arith.constant 0 : i32
    return %arg0, %c0_i32 : i32, i32
  }
}

</mosaic_0001>

<bundles_post_ra>
// kernel: _device_forward.1
= control target key start
LH: loop header
LB: loop body
LE: loop exit
PB: predicated region body
PF: predicated region fallthrough
CT: control target
= control target key end

     0   :  { %v140_v32 = vlaneseq  ;;  %s439_s1 = inlined_call_operand.vmem [shape: f32[128,128], index: 1, kind: input, shape index: {}]   ;;  %s440_s0 = inlined_call_operand.vmem [shape: f32[64,128], index: 0, kind: input, shape index: {}]   ;;  %s441_s2 = inlined_call_operand.vmem [shape: f32[64,128], index: 2, kind: output, shape index: {}]  }
   0x1   :  { %v19_v0 = vld [vmem:[%s439_s1] sm:$0xff]  ;;  %v20_v1 = vld [vmem:[%s439_s1 + $0x8] sm:$0xff]  ;;  %v21_v2 = vld [vmem:[%s439_s1 + $0x10] sm:$0xff] }
   0x2   :  { %v264_v3 = vpack.c.bf16 %v20_v1, %v19_v0  ;;  %v22_v4 = vld [vmem:[%s439_s1 + $0x18] sm:$0xff]  ;;  %v23_v6 = vld [vmem:[%s439_s1 + $0x20] sm:$0xff]  ;;  %v24_v7 = vld [vmem:[%s439_s1 + $0x28] sm:$0xff]  ;;  %v141_v33 = vand.u32 127, %v140_v32 }
   0x3   :  { %v268_v5 = vpack.c.bf16 %v22_v4, %v21_v2  ;;  %v272_v8 = vpack.c.bf16 %v24_v7, %v23_v6  ;;  %v11_v9 = vld [vmem:[%s440_s0] sm:$0xff]  ;;  %v25_v11 = vld [vmem:[%s439_s1 + $0x30] sm:$0xff]  ;;  %v26_v12 = vld [vmem:[%s439_s1 + $0x38] sm:$0xff] }
   0x4   :  { %265 = vmatprep.subr.bf16.mxu0 %v264_v3  ;;  %296 = vmatprep.subr.bf16.mxu1 %v264_v3  ;;  %v15_v10 = vld [vmem:[%s440_s0 + $0x20] sm:$0xff]  ;;  %v276_v13 = vpack.c.bf16 %v26_v12, %v25_v11  ;;  %v28_v15 = vld [vmem:[%s439_s1 + $0x48] sm:$0xff]  ;;  %v29_v17 = vld [vmem:[%s439_s1 + $0x50] sm:$0xff]  ;;  %vm142_vm0 = vcmp.lt.s32.totalorder %v141_v33, 32  ;;  %vm175_vm1 = vcmp.eq.s32.totalorder %v141_v33, 33 }
   0x5   :  { %267 = vmatpush3.bf16.msra.mxu0 %v264_v3  ;;  %304 = vmatpush3.bf16.msra.mxu1 %v264_v3  ;;  %v27_v14 = vld [vmem:[%s439_s1 + $0x40] sm:$0xff]  ;;  %v30_v18 = vld [vmem:[%s439_s1 + $0x58] sm:$0xff]  ;;  %v32_v21 = vld [vmem:[%s439_s1 + $0x68] sm:$0xff] }
   0x6   :  { %269 = vmatprep.subr.bf16.mxu0 %v268_v5  ;;  %297 = vmatprep.subr.bf16.mxu1 %v268_v5  ;;  %v280_v16 = vpack.c.bf16 %v28_v15, %v27_v14  ;;  %v284_v19 = vpack.c.bf16 %v30_v18, %v29_v17  ;;  %v31_v20 = vld [vmem:[%s439_s1 + $0x60] sm:$0xff]  ;;  %v33_v23 = vld [vmem:[%s439_s1 + $0x70] sm:$0xff]  ;;  %v34_v24 = vld [vmem:[%s439_s1 + $0x78] sm:$0xff] }
   0x7   :  { %252 = vmatprep.mubr.f32.mxu0 %v11_v9  ;;  %258 = vmatprep.mubr.f32.mxu1 %v15_v10  ;;  %v288_v22 = vpack.c.bf16 %v32_v21, %v31_v20  ;;  %v292_v25 = vpack.c.bf16 %v34_v24, %v33_v23  ;;  %v12_v26 = vld [vmem:[%s440_s0 + $0x8] sm:$0xff]  ;;  %v13_v28 = vld [vmem:[%s440_s0 + $0x10] sm:$0xff]  ;;  %v14_v30 = vld [vmem:[%s440_s0 + $0x18] sm:$0xff] }
   0x8   :  { %v16_v27 = vld [vmem:[%s440_s0 + $0x28] sm:$0xff]  ;;  %v17_v29 = vld [vmem:[%s440_s0 + $0x30] sm:$0xff]  ;;  %v18_v31 = vld [vmem:[%s440_s0 + $0x38] sm:$0xff] }
   0x9   :  { %271 = vmatpush3.bf16.msra.mxu0 %v268_v5  ;;  %305 = vmatpush3.bf16.msra.mxu1 %v268_v5 }
   0xa   :  { %273 = vmatprep.subr.bf16.mxu0 %v272_v8  ;;  %298 = vmatprep.subr.bf16.mxu1 %v272_v8 }
   0xd   :  { %275 = vmatpush3.bf16.msra.mxu0 %v272_v8  ;;  %306 = vmatpush3.bf16.msra.mxu1 %v272_v8 }
   0xe   :  { %277 = vmatprep.subr.bf16.mxu0 %v276_v13  ;;  %299 = vmatprep.subr.bf16.mxu1 %v276_v13 }
  0x11   :  { %279 = vmatpush3.bf16.msra.mxu0 %v276_v13  ;;  %307 = vmatpush3.bf16.msra.mxu1 %v276_v13 }
  0x12   :  { %281 = vmatprep.subr.bf16.mxu0 %v280_v16  ;;  %300 = vmatprep.subr.bf16.mxu1 %v280_v16 }
  0x15   :  { %283 = vmatpush3.bf16.msra.mxu0 %v280_v16  ;;  %308 = vmatpush3.bf16.msra.mxu1 %v280_v16 }
  0x16   :  { %285 = vmatprep.subr.bf16.mxu0 %v284_v19  ;;  %301 = vmatprep.subr.bf16.mxu1 %v284_v19 }
  0x19   :  { %287 = vmatpush3.bf16.msra.mxu0 %v284_v19  ;;  %309 = vmatpush3.bf16.msra.mxu1 %v284_v19 }
  0x1a   :  { %289 = vmatprep.subr.bf16.mxu0 %v288_v22  ;;  %302 = vmatprep.subr.bf16.mxu1 %v288_v22 }
  0x1d   :  { %291 = vmatpush3.bf16.msra.mxu0 %v288_v22  ;;  %310 = vmatpush3.bf16.msra.mxu1 %v288_v22 }
  0x1e   :  { %293 = vmatprep.subr.bf16.mxu0 %v292_v25  ;;  %303 = vmatprep.subr.bf16.mxu1 %v292_v25 }
  0x21   :  { %295 = vmatpush3.bf16.msra.mxu0 %v292_v25  ;;  %311 = vmatpush3.bf16.msra.mxu1 %v292_v25 }
  0x24   :  { %253 = vmatmul.mubr.f32.vlgmr.msra.gmra.mrb[0].mxu0 %v12_v26  ;;  %259 = vmatmul.mubr.f32.vlgmr.msra.gmra.mrb[0].mxu1 %v16_v27 }
  0x25   :  { %255 = vmatprep.mubr.f32.mxu0 %v13_v28  ;;  %261 = vmatprep.mubr.f32.mxu1 %v17_v29 }
  0x28   :  { %256 = vmatmul.mubr.f32.gmra.mrb[2].mxu0 %v14_v30  ;;  %262 = vmatmul.mubr.f32.gmra.mrb[2].mxu1 %v18_v31 }
  0xf7   :  { %v254_v34 = vpop.f32.mrb[0].mxu0  ;;  %v260_v35 = vpop.f32.mrb[0].mxu1 }
  0xf8   :  { %v101_v36 = vpop.f32.mrb[1].mxu0  ;;  %v121_v37 = vpop.f32.mrb[1].mxu1  ;;  %v148_v38 = vsel %vm142_vm0, %v260_v35, 0.0  ;;  %v144_v39 = vsel %vm142_vm0, %v254_v34, 0.0 }
  0xf9   :  { %v156_v40 = vmul.f32 %v148_v38, %v148_v38  ;;  %v152_v41 = vmul.f32 %v144_v39, %v144_v39  ;;  %v143_v42 = vsel %vm142_vm0, %v101_v36, 0.0  ;;  %v147_v51 = vsel %vm142_vm0, %v121_v37, 0.0 }
  0xfa   :  { %v151_v48 = vmul.f32 %v143_v42, %v143_v42  ;;  %v155_v55 = vmul.f32 %v147_v51, %v147_v51 }
  0xfb   :  { %169 = vadd.xlane.f32.xlu1 %v156_v40  ;;  %161 = vadd.xlane.f32.xlu0 %v152_v41  ;;  %v257_v43 = vpop.f32.mrb[2].mxu0  ;;  %v263_v44 = vpop.f32.mrb[2].mxu1 }
  0xfc   :  { %v111_v45 = vpop.f32.mrb[3].mxu0  ;;  %v146_v46 = vsel %vm142_vm0, %v257_v43, 0.0  ;;  %v131_v47 = vpop.f32.mrb[3].mxu1  ;;  %v150_v53 = vsel %vm142_vm0, %v263_v44, 0.0 }
  0xfd   :  { %v154_v49 = vmul.f32 %v146_v46, %v146_v46  ;;  %v145_v50 = vsel %vm142_vm0, %v111_v45, 0.0  ;;  %v149_v52 = vsel %vm142_vm0, %v131_v47, 0.0  ;;  %v158_v57 = vmul.f32 %v150_v53, %v150_v53 }
  0xfe   :  { %v153_v54 = vmul.f32 %v145_v50, %v145_v50  ;;  %v157_v56 = vmul.f32 %v149_v52, %v149_v52 }
  0xff   :  { %159 = vadd.xlane.f32.xlu0 %v151_v48  ;;  %165 = vadd.xlane.f32.xlu1 %v154_v49 }
 0x103   :  { %167 = vadd.xlane.f32.xlu0 %v155_v55  ;;  %163 = vadd.xlane.f32.xlu1 %v153_v54 }
 0x107   :  { %171 = vadd.xlane.f32.xlu0 %v157_v56  ;;  %173 = vadd.xlane.f32.xlu1 %v158_v57 }
 0x188   :  { %v170_v58 = vpop.xlane.xlu1 %169  ;;  %v162_v59 = vpop.xlane.xlu0 %161 }
 0x189   :  { %v181_v60 = vsel %vm175_vm1, %v170_v58, %v260_v35  ;;  %v177_v61 = vsel %vm175_vm1, %v162_v59, %v254_v34 }
 0x18a   :  { %189 = vst [vmem:[%s441_s2 + $0x28] sm:$0xff] %v181_v60  ;;  %185 = vst [vmem:[%s441_s2 + $0x8] sm:$0xff] %v177_v61 }
 0x18c   :  { %v160_v62 = vpop.xlane.xlu0 %159  ;;  %v166_v63 = vpop.xlane.xlu1 %165 }
 0x18d   :  { %v176_v0 = vsel %vm175_vm1, %v160_v62, %v101_v36  ;;  %v179_v1 = vsel %vm175_vm1, %v166_v63, %v257_v43 }
 0x18e   :  { %184 = vst [vmem:[%s441_s2] sm:$0xff] %v176_v0  ;;  %187 = vst [vmem:[%s441_s2 + $0x18] sm:$0xff] %v179_v1 }
 0x190   :  { %v168_v2 = vpop.xlane.xlu0 %167  ;;  %v164_v3 = vpop.xlane.xlu1 %163 }
 0x191   :  { %v180_v4 = vsel %vm175_vm1, %v168_v2, %v121_v37  ;;  %v178_v5 = vsel %vm175_vm1, %v164_v3, %v111_v45 }
 0x192   :  { %188 = vst [vmem:[%s441_s2 + $0x20] sm:$0xff] %v180_v4  ;;  %186 = vst [vmem:[%s441_s2 + $0x10] sm:$0xff] %v178_v5 }
 0x194   :  { %v172_v6 = vpop.xlane.xlu0 %171  ;;  %v174_v7 = vpop.xlane.xlu1 %173 }
 0x195   :  { %v182_v8 = vsel %vm175_vm1, %v172_v6, %v131_v47  ;;  %v183_v9 = vsel %vm175_vm1, %v174_v7, %v263_v44 }
 0x196   :  { %190 = vst [vmem:[%s441_s2 + $0x30] sm:$0xff] %v182_v8  ;;  %191 = vst [vmem:[%s441_s2 + $0x38] sm:$0xff] %v183_v9 }

</bundles_post_ra>
